<compile_context>
chip_gen: v7x
topology: tpu7x:2x2x1
jax: 0.10.0
libtpu: 0.0.40
codegen_flags: <defaults>
</compile_context>

<pallas_src>
import functools

import jax
import jax.numpy as jnp
from jax import lax
from jax.experimental import pallas as pl
from jax.experimental.pallas import tpu as pltpu

LN_EPS = 1e-5  # torch.nn.LayerNorm default


def _round_up(x, m):
    return ((x + m - 1) // m) * m


def _ffn_addnorm_kernel(x_ref, w1_ref, b1_ref, w2_ref, b2_ref,
                        gamma_ref, beta_ref, o_ref, acc_ref, *, inv_dm):
    """Grid = (row_tiles, dff_tiles).

    For each row tile i and d_ff chunk k:
        acc += relu(x @ W1[:, k] + b1[k]) @ W2[k, :]      (acc seeded with b2)
    At the last k:
        out = LayerNorm(x + acc) * gamma + beta
    """
    k = pl.program_id(1)

    @pl.when(k == 0)
    def _():
        # Seed the accumulator with the second affine bias (saves the b2 add
        # and its broadcast in the finalize epilogue).
        acc_ref[...] = jnp.broadcast_to(
            b2_ref[...].astype(jnp.float32), acc_ref.shape)

    x = x_ref[...]                                              # (tm, d_m)

    # b1 is fully VMEM-resident (constant index_map -> single DMA for the
    # whole kernel); grab the current d_ff chunk via a dynamic sublane index.
    b1 = b1_ref[pl.ds(k, 1), :].astype(jnp.float32)             # (1, tff)

    # Explicit compute dtype: matmuls run in the weights' dtype (bf16 weights
    # hit the fast MXU path); accumulation is f32 via preferred_element_type.
    h = jnp.dot(x.astype(w1_ref.dtype), w1_ref[...],
                preferred_element_type=jnp.float32)             # (tm, tff)
    h = jnp.maximum(h + b1, 0.0)
    acc_ref[...] += jnp.dot(h.astype(w2_ref.dtype), w2_ref[...],
                            preferred_element_type=jnp.float32)

    @pl.when(k == pl.num_programs(1) - 1)
    def _():
        gamma = gamma_ref[...].astype(jnp.float32)
        beta = beta_ref[...].astype(jnp.float32)

        # Residual (dropout(p=0.01) == identity at inference).
        # TODO(synk): training-mode dropout would need pltpu.prng_* masking.
        r = acc_ref[...] + x.astype(jnp.float32)                # (tm, d_m)

        # Two-pass LayerNorm: mean first, then centered sum of squares
        # (numerically safer than E[x^2]-E[x]^2); rsqrt goes to the EUP.
        mean = jnp.sum(r, axis=-1, keepdims=True) * inv_dm
        c = r - mean
        var = jnp.sum(c * c, axis=-1, keepdims=True) * inv_dm
        o_ref[...] = (c * lax.rsqrt(var + LN_EPS) * gamma + beta).astype(o_ref.dtype)


def _vmem_bytes(tm, tff, d_m, d_ff, x_isz, w_isz):
    """Rough VMEM footprint: double-buffered tiles, f32 accumulator, the
    (tm, tff) relu intermediate + its narrow cast, and LN temporaries."""
    f32 = 4
    return (2 * tm * d_m * x_isz            # x row tile (double-buffered)
            + 2 * tm * d_m * x_isz          # output tile
            + 2 * d_m * tff * w_isz         # W1 chunk
            + 2 * tff * d_m * w_isz         # W2 chunk
            + 2 * d_ff * w_isz              # b1 (full, resident)
            + 6 * d_m * x_isz               # b2, gamma, beta
            + tm * d_m * f32                # f32 accumulator scratch
            + tm * tff * (f32 + w_isz)      # relu intermediate + cast
            + 2 * tm * d_m * f32)           # LN temporaries


def position_wise_ff_layer(x, w1, b1, w2, b2, gamma, beta, *, tm=256, tff=512):
    """x: [B, L, d_m] -> [B, L, d_m].

    tm  : row tile request (rounded to 16 for bf16 sublane packing).
    tff : d_ff reduction-tile request (only used when the weights do not fit
          VMEM-resident; always snapped to a 128-multiple divisor of d_ff).

    NOTE: for production shapes keep d_m a multiple of 128 (ideally 256 on
    v6e/v7x) so the output tile is lane-dense and the MXU is fully fed; the
    toy self-test shapes are smaller but remain correct.
    """
    B, L, d_m = x.shape
    d_ff = w1.shape[1]
    rows = B * L

    x_isz = jnp.dtype(x.dtype).itemsize
    w_isz = jnp.dtype(w1.dtype).itemsize

    # Physical VMEM per TensorCore (v5e/v6e: 128 MiB, v7x: 64 MiB); keep
    # headroom for Mosaic's internal scratch.
    try:
        vmem_cap = int(pltpu.get_tpu_info().vmem_capacity_bytes)
    except Exception:
        vmem_cap = 64 * 1024 * 1024          # conservative (v7x) fallback
    vmem_ceiling = min(vmem_cap * 3 // 4, 100 * 1024 * 1024)
    budget = int(vmem_ceiling * 0.85)

    # Row tile: multiple of 16, capped at the row count; prefer >= 2 row tiles
    # so the "parallel" axis has work for both TensorCores (megacore / v7x).
    tm_eff = _round_up(min(tm, _round_up(rows, 16)), 16)
    if rows > 32 and _round_up(rows, tm_eff) // tm_eff < 2:
        tm_eff = _round_up((rows + 1) // 2, 16)

    # d_ff tile: keep W1/W2 fully VMEM-resident when they fit (their
    # index_map becomes constant -> weights stream from HBM exactly once);
    # otherwise pick the largest 128-multiple divisor of d_ff within budget.
    if _vmem_bytes(tm_eff, d_ff, d_m, d_ff, x_isz, w_isz) <= budget:
        tff_eff = d_ff
    else:
        divisors = [t for t in range(128, min(tff, d_ff) + 1, 128)
                    if d_ff % t == 0]
        tff_eff = None
        for t in sorted(divisors, reverse=True):
            if _vmem_bytes(tm_eff, t, d_m, d_ff, x_isz, w_isz) <= budget:
                tff_eff = t
                break
        if tff_eff is None:
            tff_eff = divisors[0] if divisors else d_ff
    # If still over budget (very large d_m), shrink the row tile.
    while (_vmem_bytes(tm_eff, tff_eff, d_m, d_ff, x_isz, w_isz) > budget
           and tm_eff > 64):
        tm_eff = _round_up(tm_eff // 2, 16)

    rows_p = _round_up(rows, tm_eff)
    n_row_tiles = rows_p // tm_eff
    n_ff_tiles = d_ff // tff_eff
    grid = (n_row_tiles, n_ff_tiles)

    x2 = x.reshape(rows, d_m)
    if rows_p != rows:
        x2 = jnp.pad(x2, ((0, rows_p - rows), (0, 0)))

    b1_2 = b1.reshape(n_ff_tiles, tff_eff)     # row k == d_ff chunk k
    b2_2 = b2.reshape(1, d_m)
    g2 = gamma.reshape(1, d_m)
    bt2 = beta.reshape(1, d_m)

    vmem_needed = _vmem_bytes(tm_eff, tff_eff, d_m, d_ff, x_isz, w_isz)
    vmem_limit = int(min(vmem_ceiling,
                         max(32 * 1024 * 1024, int(1.5 * vmem_needed))))

    # Weights are streamed once per row tile when chunked, once total when
    # VMEM-resident (constant index_map).
    weight_streams = 1 if tff_eff == d_ff else n_row_tiles
    cost = pl.CostEstimate(
        flops=2 * 2 * rows * d_m * d_ff,                # two matmuls
        transcendentals=rows,                           # one rsqrt per row
        bytes_accessed=int(2 * rows * d_m * x_isz
                           + (w1.size + w2.size + b1.size) * w_isz * weight_streams
                           + (b2.size + gamma.size + beta.size) * x_isz),
    )

    kernel = functools.partial(_ffn_addnorm_kernel, inv_dm=1.0 / d_m)

    out2 = pl.pallas_call(
        kernel,
        out_shape=jax.ShapeDtypeStruct((rows_p, d_m), x.dtype),
        grid_spec=pltpu.PrefetchScalarGridSpec(
            num_scalar_prefetch=0,
            grid=grid,
            in_specs=[
                pl.BlockSpec((tm_eff, d_m), lambda i, k: (i, 0)),          # x
                pl.BlockSpec((d_m, tff_eff), lambda i, k: (0, k)),         # W1
                pl.BlockSpec((n_ff_tiles, tff_eff), lambda i, k: (0, 0)),  # b1 (resident)
                pl.BlockSpec((tff_eff, d_m), lambda i, k: (k, 0)),         # W2
                pl.BlockSpec((1, d_m), lambda i, k: (0, 0)),               # b2
                pl.BlockSpec((1, d_m), lambda i, k: (0, 0)),               # gamma
                pl.BlockSpec((1, d_m), lambda i, k: (0, 0)),               # beta
            ],
            out_specs=pl.BlockSpec((tm_eff, d_m), lambda i, k: (i, 0)),
            scratch_shapes=[pltpu.VMEM((tm_eff, d_m), jnp.float32)],
        ),
        compiler_params=pltpu.CompilerParams(
            dimension_semantics=("parallel", "arbitrary"),
            vmem_limit_bytes=vmem_limit),
        cost_estimate=cost,
    )(x2, w1, b1_2, w2, b2_2, g2, bt2)

    if rows_p != rows:
        out2 = out2[:rows]
    return out2.reshape(B, L, d_m)


def _reference(x, w1, b1, w2, b2, gamma, beta):
    h = jnp.maximum(x @ w1 + b1, 0.0)
    y = h @ w2 + b2
    r = x + y
    mean = jnp.mean(r, axis=-1, keepdims=True)
    var = jnp.mean((r - mean) ** 2, axis=-1, keepdims=True)
    return (r - mean) / jnp.sqrt(var + LN_EPS) * gamma + beta


if __name__ == "__main__":
    B, L, d_m, d_ff = 2, 8, 32, 64

    key = jax.random.PRNGKey(0)
    kx, k1, k2, k3, k4 = jax.random.split(key, 5)

    x = jax.random.normal(kx, (B, L, d_m), dtype=jnp.float32)
    w1 = jax.random.normal(k1, (d_m, d_ff), dtype=jnp.float32) * 0.1
    b1 = jax.random.normal(k2, (d_ff,), dtype=jnp.float32) * 0.1
    w2 = jax.random.normal(k3, (d_ff, d_m), dtype=jnp.float32) * 0.1
    b2 = jax.random.normal(k4, (d_m,), dtype=jnp.float32) * 0.1
    gamma = jnp.ones((d_m,), dtype=jnp.float32)
    beta = jnp.zeros((d_m,), dtype=jnp.float32)

    out = position_wise_ff_layer(x, w1, b1, w2, b2, gamma, beta)
    out = jax.block_until_ready(out)

    ref = _reference(x, w1, b1, w2, b2, gamma, beta)
    assert out.shape == (B, L, d_m)
    assert jnp.allclose(out, ref, atol=1e-4, rtol=1e-4), "mismatch vs reference"

    print("KERNEL_OK")
</pallas_src>

<mosaic_0001>
module attributes {stable_mosaic.version = 11 : i64} {
  func.func @_ffn_addnorm_kernel(%arg0: i32, %arg1: i32, %arg2: memref<16x32xf32, #tpu.memory_space<vmem>>, %arg3: memref<32x64xf32, #tpu.memory_space<vmem>>, %arg4: memref<1x64xf32, #tpu.memory_space<vmem>>, %arg5: memref<64x32xf32, #tpu.memory_space<vmem>>, %arg6: memref<1x32xf32, #tpu.memory_space<vmem>>, %arg7: memref<1x32xf32, #tpu.memory_space<vmem>>, %arg8: memref<1x32xf32, #tpu.memory_space<vmem>>, %arg9: memref<16x32xf32, #tpu.memory_space<vmem>>, %arg10: memref<16x32xf32, #tpu.memory_space<vmem>>) attributes {dimension_semantics = [#tpu.dimension_semantics<parallel>, #tpu.dimension_semantics<arbitrary>], iteration_bounds = array<i64: 1, 1>, scalar_prefetch = 0 : i64, scratch_operands = 1 : i64, tpu.core_type = #tpu.core_type<tc>, window_params = [{transform_indices = @transform_0, window_bounds = array<i64: 16, 32>}, {transform_indices = @transform_1, window_bounds = array<i64: 32, 64>}, {pipeline_mode = #tpu.pipeline_mode<synchronous>, transform_indices = @transform_2, window_bounds = array<i64: 1, 64>}, {transform_indices = @transform_3, window_bounds = array<i64: 64, 32>}, {pipeline_mode = #tpu.pipeline_mode<synchronous>, transform_indices = @transform_4, window_bounds = array<i64: 1, 32>}, {pipeline_mode = #tpu.pipeline_mode<synchronous>, transform_indices = @transform_5, window_bounds = array<i64: 1, 32>}, {pipeline_mode = #tpu.pipeline_mode<synchronous>, transform_indices = @transform_6, window_bounds = array<i64: 1, 32>}, {transform_indices = @transform_7, window_bounds = array<i64: 16, 32>}]} {
    %c0_i32 = arith.constant 0 : i32
    %0 = arith.cmpi eq, %arg1, %c0_i32 : i32
    %1 = arith.extui %0 : i1 to i32
    %c0_i32_0 = arith.constant 0 : i32
    %2 = arith.cmpi ne, %1, %c0_i32_0 : i32
    scf.if %2 {
      %c0_15 = arith.constant 0 : index
      %c0_16 = arith.constant 0 : index
      %20 = vector.load %arg6[%c0_15, %c0_16] : memref<1x32xf32, #tpu.memory_space<vmem>>, vector<1x32xf32>
      %21 = vector.shape_cast %20 : vector<1x32xf32> to vector<1x32xf32>
      %22 = vector.broadcast %21 : vector<1x32xf32> to vector<16x32xf32>
      %c0_17 = arith.constant 0 : index
      %c0_18 = arith.constant 0 : index
      %23 = vector.load %arg10[%c0_17, %c0_18] : memref<16x32xf32, #tpu.memory_space<vmem>>, vector<16x32xf32>
      tpu.vector_store %arg10[%c0_17, %c0_18], %22 {strides = array<i32>} : memref<16x32xf32, #tpu.memory_space<vmem>>, vector<16x32xf32>,
    } else {
    }
    %c0 = arith.constant 0 : index
    %c0_1 = arith.constant 0 : index
    %3 = vector.load %arg2[%c0, %c0_1] : memref<16x32xf32, #tpu.memory_space<vmem>>, vector<16x32xf32>
    %4 = arith.index_cast %arg1 : i32 to index
    %c0_2 = arith.constant 0 : index
    %5 = vector.load %arg4[%4, %c0_2] : memref<1x64xf32, #tpu.memory_space<vmem>>, vector<1x64xf32>
    %c0_3 = arith.constant 0 : index
    %c0_4 = arith.constant 0 : index
    %6 = vector.load %arg3[%c0_3, %c0_4] : memref<32x64xf32, #tpu.memory_space<vmem>>, vector<32x64xf32>
    %cst = arith.constant dense<0.000000e+00> : vector<16x64xf32>
    %7 = tpu.matmul %3, %6, %cst {dimension_numbers = #tpu.dot_dimension_numbers<[1], [0], [0], [1], [0, 0, 1, 1], [], []>} : vector<16x32xf32>, vector<32x64xf32>, vector<16x64xf32> -> vector<16x64xf32>
    %8 = vector.broadcast %5 : vector<1x64xf32> to vector<16x64xf32>
    %9 = arith.addf %7, %8 : vector<16x64xf32>
    %cst_5 = arith.constant 0.000000e+00 : f32
    %10 = vector.broadcast %cst_5 : f32 to vector<16x64xf32>
    %11 = arith.maximumf %9, %10 : vector<16x64xf32>
    %c0_6 = arith.constant 0 : index
    %c0_7 = arith.constant 0 : index
    %12 = vector.load %arg10[%c0_6, %c0_7] : memref<16x32xf32, #tpu.memory_space<vmem>>, vector<16x32xf32>
    %c0_8 = arith.constant 0 : index
    %c0_9 = arith.constant 0 : index
    %13 = vector.load %arg5[%c0_8, %c0_9] : memref<64x32xf32, #tpu.memory_space<vmem>>, vector<64x32xf32>
    %cst_10 = arith.constant dense<0.000000e+00> : vector<16x32xf32>
    %14 = tpu.matmul %11, %13, %cst_10 {dimension_numbers = #tpu.dot_dimension_numbers<[1], [0], [0], [1], [0, 0, 1, 1], [], []>} : vector<16x64xf32>, vector<64x32xf32>, vector<16x32xf32> -> vector<16x32xf32>
    %15 = arith.addf %12, %14 : vector<16x32xf32>
    %c0_11 = arith.constant 0 : index
    %c0_12 = arith.constant 0 : index
    %16 = vector.load %arg10[%c0_11, %c0_12] : memref<16x32xf32, #tpu.memory_space<vmem>>, vector<16x32xf32>
    tpu.vector_store %arg10[%c0_11, %c0_12], %15 {strides = array<i32>} : memref<16x32xf32, #tpu.memory_space<vmem>>, vector<16x32xf32>,
    %c0_i32_13 = arith.constant 0 : i32
    %17 = arith.cmpi eq, %arg1, %c0_i32_13 : i32
    %18 = arith.extui %17 : i1 to i32
    %c0_i32_14 = arith.constant 0 : i32
    %19 = arith.cmpi ne, %18, %c0_i32_14 : i32
    scf.if %19 {
      %c0_15 = arith.constant 0 : index
      %c0_16 = arith.constant 0 : index
      %20 = vector.load %arg7[%c0_15, %c0_16] : memref<1x32xf32, #tpu.memory_space<vmem>>, vector<1x32xf32>
      %c0_17 = arith.constant 0 : index
      %c0_18 = arith.constant 0 : index
      %21 = vector.load %arg8[%c0_17, %c0_18] : memref<1x32xf32, #tpu.memory_space<vmem>>, vector<1x32xf32>
      %c0_19 = arith.constant 0 : index
      %c0_20 = arith.constant 0 : index
      %22 = vector.load %arg10[%c0_19, %c0_20] : memref<16x32xf32, #tpu.memory_space<vmem>>, vector<16x32xf32>
      %23 = arith.addf %22, %3 : vector<16x32xf32>
      %cst_21 = arith.constant dense<0.000000e+00> : vector<16xf32>
      %24 = vector.multi_reduction <add>, %23, %cst_21 [1] : vector<16x32xf32> to vector<16xf32>
      %25 = vector.shape_cast %24 : vector<16xf32> to vector<16x1xf32>
      %cst_22 = arith.constant 3.125000e-02 : f32
      %26 = vector.broadcast %cst_22 : f32 to vector<16x1xf32>
      %27 = arith.mulf %25, %26 : vector<16x1xf32>
      %28 = vector.broadcast %27 : vector<16x1xf32> to vector<16x32xf32>
      %29 = arith.subf %23, %28 : vector<16x32xf32>
      %30 = arith.mulf %29, %29 : vector<16x32xf32>
      %cst_23 = arith.constant dense<0.000000e+00> : vector<16xf32>
      %31 = vector.multi_reduction <add>, %30, %cst_23 [1] : vector<16x32xf32> to vector<16xf32>
      %32 = vector.shape_cast %31 : vector<16xf32> to vector<16x1xf32>
      %cst_24 = arith.constant 3.125000e-02 : f32
      %33 = vector.broadcast %cst_24 : f32 to vector<16x1xf32>
      %34 = arith.mulf %32, %33 : vector<16x1xf32>
      %cst_25 = arith.constant 9.99999974E-6 : f32
      %35 = vector.broadcast %cst_25 : f32 to vector<16x1xf32>
      %36 = arith.addf %34, %35 : vector<16x1xf32>
      %37 = math.rsqrt %36 : vector<16x1xf32>
      %38 = vector.broadcast %37 : vector<16x1xf32> to vector<16x32xf32>
      %39 = arith.mulf %29, %38 : vector<16x32xf32>
      %40 = vector.broadcast %20 : vector<1x32xf32> to vector<16x32xf32>
      %41 = arith.mulf %39, %40 : vector<16x32xf32>
      %42 = vector.broadcast %21 : vector<1x32xf32> to vector<16x32xf32>
      %43 = arith.addf %41, %42 : vector<16x32xf32>
      %c0_26 = arith.constant 0 : index
      %c0_27 = arith.constant 0 : index
      %44 = vector.load %arg9[%c0_26, %c0_27] : memref<16x32xf32, #tpu.memory_space<vmem>>, vector<16x32xf32>
      tpu.vector_store %arg9[%c0_26, %c0_27], %43 {strides = array<i32>} : memref<16x32xf32, #tpu.memory_space<vmem>>, vector<16x32xf32>,
    } else {
    }
    return
  }
  func.func @transform_0(%arg0: i32, %arg1: i32) -> (i32, i32) {
    %c0_i32 = arith.constant 0 : i32
    %c0_i32_0 = arith.constant 0 : i32
    return %arg0, %c0_i32 : i32, i32
  }
  func.func @transform_1(%arg0: i32, %arg1: i32) -> (i32, i32) {
    %c0_i32 = arith.constant 0 : i32
    %c0_i32_0 = arith.constant 0 : i32
    return %c0_i32, %arg1 : i32, i32
  }
  func.func @transform_2(%arg0: i32, %arg1: i32) -> (i32, i32) {
    %c0_i32 = arith.constant 0 : i32
    %c0_i32_0 = arith.constant 0 : i32
    %c0_i32_1 = arith.constant 0 : i32
    return %c0_i32, %c0_i32_0 : i32, i32
  }
  func.func @transform_3(%arg0: i32, %arg1: i32) -> (i32, i32) {
    %c0_i32 = arith.constant 0 : i32
    %c0_i32_0 = arith.constant 0 : i32
    return %arg1, %c0_i32 : i32, i32
  }
  func.func @transform_4(%arg0: i32, %arg1: i32) -> (i32, i32) {
    %c0_i32 = arith.constant 0 : i32
    %c0_i32_0 = arith.constant 0 : i32
    %c0_i32_1 = arith.constant 0 : i32
    return %c0_i32, %c0_i32_0 : i32, i32
  }
  func.func @transform_5(%arg0: i32, %arg1: i32) -> (i32, i32) {
    %c0_i32 = arith.constant 0 : i32
    %c0_i32_0 = arith.constant 0 : i32
    %c0_i32_1 = arith.constant 0 : i32
    return %c0_i32, %c0_i32_0 : i32, i32
  }
  func.func @transform_6(%arg0: i32, %arg1: i32) -> (i32, i32) {
    %c0_i32 = arith.constant 0 : i32
    %c0_i32_0 = arith.constant 0 : i32
    %c0_i32_1 = arith.constant 0 : i32
    return %c0_i32, %c0_i32_0 : i32, i32
  }
  func.func @transform_7(%arg0: i32, %arg1: i32) -> (i32, i32) {
    %c0_i32 = arith.constant 0 : i32
    %c0_i32_0 = arith.constant 0 : i32
    return %arg0, %c0_i32 : i32, i32
  }
}

</mosaic_0001>

<bundles_post_ra>
// kernel: tpu_custom_call.1
= control target key start
LH: loop header
LB: loop body
LE: loop exit
PB: predicated region body
PF: predicated region fallthrough
CT: control target
= control target key end

     0   :  { %vm38_vm0 = vcmask 261120   ;;  %s533_s0 = inlined_call_operand.vmem [shape: f32[16,32], index: 0, kind: input, shape index: {}]   ;;  %s534_s1 = inlined_call_operand.vmem [shape: f32[32,64], index: 1, kind: input, shape index: {}]   ;;  %s535_s2 = inlined_call_operand.vmem [shape: f32[1,64], index: 2, kind: input, shape index: {}]   ;;  %s536_s3 = inlined_call_operand.vmem [shape: f32[64,32], index: 3, kind: input, shape index: {}]   ;;  %s537_s4 = inlined_call_operand.vmem [shape: f32[1,32], index: 4, kind: input, shape index: {}]   ;;  %s538_s5 = inlined_call_operand.vmem [shape: f32[1,32], index: 5, kind: input, shape index: {}]   ;;  %s539_s6 = inlined_call_operand.vmem [shape: f32[1,32], index: 6, kind: input, shape index: {}]   ;;  %s540_s7 = inlined_call_operand.hbm [shape: f32[16,32], index: 7, kind: output, shape index: {}]  }
   0x1   :  { %v44_v0 = vld [vmem:[%s534_s1] sm:$0xff]  ;;  %v45_v1 = vld [vmem:[%s534_s1 + $0x8] sm:$0xff]  ;;  %v46_v2 = vld [vmem:[%s534_s1 + $0x10] sm:$0xff] }
   0x2   :  { %v357_v3 = vpack.c.bf16 %v45_v1, %v44_v0  ;;  %v47_v4 = vld [vmem:[%s534_s1 + $0x18] sm:$0xff]  ;;  %v41_v5 = vld [vmem:[%s533_s0] sm:$0xff]  ;;  %v141_v8 = vld [vmem:[%s536_s3 + $0x8] sm:$0xff] }
   0x3   :  { %v361_v6 = vpack.c.bf16 %v47_v4, %v46_v2  ;;  %335 = vmatprep.mubr.msk.f32.mxu0 %vm38_vm0, %v41_v5  ;;  %v140_v7 = vld [vmem:[%s536_s3] sm:$0xff]  ;;  %v142_v9 = vld [vmem:[%s536_s3 + $0x10] sm:$0xff]  ;;  %v143_v11 = vld [vmem:[%s536_s3 + $0x18] sm:$0xff] }
   0x4   :  { %358 = vmatprep.subr.bf16.mxu0 %v357_v3  ;;  %v365_v10 = vpack.c.bf16 %v141_v8, %v140_v7  ;;  %v369_v12 = vpack.c.bf16 %v143_v11, %v142_v9  ;;  %v144_v13 = vld [vmem:[%s536_s3 + $0x20] sm:$0xff]  ;;  %v145_v14 = vld [vmem:[%s536_s3 + $0x28] sm:$0xff] }
   0x5   :  { %360 = vmatpush3.bf16.msra.mxu0 %v357_v3 }
   0x6   :  { %12 = vsyncpa [#allocation4], 0  ;;  %362 = vmatprep.subr.bf16.mxu0 %v361_v6  ;;  %366 = vmatprep.subr.bf16.mxu1 %v365_v10  ;;  %v373_v15 = vpack.c.bf16 %v145_v14, %v144_v13  ;;  %v42_v16 = vld [vmem:[%s533_s0 + $0x8] sm:$0xff]  ;;  %v146_v17 = vld [vmem:[%s536_s3 + $0x30] sm:$0xff]  ;;  %vm148_vm1 = vcmask 523264   ;;  %s412_s9 = smov [#allocation3]  }
   0x7   :  { %368 = vmatpush3.bf16.msra.mxu1 %v365_v10  ;;  %v147_v18 = vld [vmem:[%s536_s3 + $0x38] sm:$0xff]  ;;  %v303_v20 = vld [vmem:[%s537_s4] ss:$0 sm:$0xff]  ;;  %s292_s10 = sshll.u32 %s412_s9, 4  ;;  %s293_s10 = int_to_ptr.vmem [resolvable:$true] %s292_s10 }
   0x8   :  { %370 = vmatprep.subr.bf16.mxu1 %v369_v12  ;;  %v377_v19 = vpack.c.bf16 %v147_v18, %v146_v17  ;;  %40 = vst.msk [vmem:[#allocation2 + $0x8] sm:$0xff] %vm38_vm0, %v303_v20  ;;  %39 = vst.msk [vmem:[#allocation2] sm:$0xff] %vm38_vm0, %v303_v20  ;;  %v304_v21 = vld [vmem:[%s535_s2] ss:$0 sm:$0xff]  ;;  %s388_s11 = scalar_lea.vmem %s293_s10, 256  ;;  %p393_p1 = scmp.lt.s32.totalorder %s293_s10, %s293_s10 }
   0x9   :  { %364 = vmatpush3.bf16.msra.mxu0 %v361_v6  ;;  %v309_v57 = vld [vmem:[%s538_s5] ss:$0 sm:$0xff]  ;;  %p389_p0 = scmp.ne.s32.totalorder %s293_s10, %s388_s11  ;;  %p394_p2 = scmp.lt.s32.totalorder %s388_s11, %s388_s11 }
   0xa   :  { %v310_v59 = vld [vmem:[%s539_s6] ss:$0 sm:$0xff] }
   0xb   :  { %372 = vmatpush3.bf16.msra.mxu1 %v369_v12  ;;  %p395_p3 = por %p394_p2, %p393_p1 }
   0xc   :  { %336 = vmatmul.mubr.msk.f32.vlgmr.msra.gmra.mrb[0].mxu0 %vm38_vm0, %v42_v16  ;;  %374 = vmatprep.subr.bf16.mxu1 %v373_v15 }
   0xd   :  { %p396_p4 = pnand %p395_p3, %p389_p0 }
   0xf   :  { %376 = vmatpush3.bf16.msra.mxu1 %v373_v15  ;;  %v139_v28 = vld [vmem:[#allocation2 + $0x8] sm:$0xff]  ;;  %v138_v29 = vld [vmem:[#allocation2] sm:$0xff] }
  0x10   :  { %378 = vmatprep.subr.bf16.mxu1 %v377_v19 }
  0x13   :  { %380 = vmatpush3.bf16.msra.mxu1 %v377_v19 }
  0xdf   :  { %v337_v22 = vpop.f32.mrb[0].mxu0 }
  0xe0   :  { %v133_v23 = vadd.f32 %v337_v22, %v304_v21  ;;  %v127_v24 = vpop.f32.mrb[1].mxu0 }
  0xe1   :  { %v128_v25 = vadd.f32 %v304_v21, %v127_v24 }
  0xe2   :  { %v137_v27 = vmax.f32 %v133_v23, 0.0 }
  0xe3   :  { %v136_v26 = vmax.f32 %v128_v25, 0.0 }
  0xe5   :  { %354 = vmatprep.mubr.msk.f32.mxu1 %vm148_vm1, %v136_v26 }
  0xe6   :  { %355 = vmatmul.mubr.msk.f32.vlgmr.msra.gmra.mrb[0].mxu1 %vm148_vm1, %v137_v27 }
 0x1b9   :  { %v356_v30 = vpop.f32.mrb[0].mxu1 }
 0x1ba   :  { %v231_v31 = vadd.f32 %v356_v30, %v139_v28  ;;  %v221_v32 = vpop.f32.mrb[1].mxu1 }
 0x1bb   :  { %v230_v33 = vadd.f32 %v221_v32, %v138_v29 }
 0x1bc   :  { %233 = vst.msk [vmem:[#allocation2 + $0x8] sm:$0xff] %vm38_vm0, %v231_v31 }
 0x1bd   :  { %232 = vst.msk [vmem:[#allocation2] sm:$0xff] %vm38_vm0, %v230_v33 }
 0x1c3   :  { %v240_v35 = vld [vmem:[#allocation2 + $0x8] sm:$0xff] }
 0x1c4   :  { %v239_v34 = vld [vmem:[#allocation2] sm:$0xff]  ;;  %v242_v38 = vadd.f32 %v240_v35, %v42_v16 }
 0x1c5   :  { %v241_v36 = vadd.f32 %v239_v34, %v41_v5 }
 0x1c6   :  { %v246_v39 = vsel %vm38_vm0, %v242_v38, 0.0 }
 0x1c7   :  { %v243_v37 = vsel %vm38_vm0, %v241_v36, 0.0 }
 0x1c8   :  { %244 = vadd.xlane.f32.xlu0 %v243_v37 }
 0x1cc   :  { %247 = vadd.xlane.f32.xlu0 %v246_v39 }
 0x255   :  { %v245_v40 = vpop.xlane.xlu0 %244 }
 0x256   :  { %v249_v41 = vmul.f32 0.03125, %v245_v40 }
 0x258   :  { %v251_v42 = vsub.f32 %v241_v36, %v249_v41 }
 0x259   :  { %v248_v43 = vpop.xlane.xlu0 %247 }
 0x25a   :  { %v250_v44 = vmul.f32 0.03125, %v248_v43  ;;  %v253_v45 = vmul.f32 %v251_v42, %v251_v42 }
 0x25c   :  { %v252_v46 = vsub.f32 %v242_v38, %v250_v44  ;;  %v255_v47 = vsel %vm38_vm0, %v253_v45, 0.0 }
 0x25d   :  { %256 = vadd.xlane.f32.xlu1 %v255_v47 }
 0x25e   :  { %v254_v48 = vmul.f32 %v252_v46, %v252_v46 }
 0x260   :  { %v258_v49 = vsel %vm38_vm0, %v254_v48, 0.0 }
 0x261   :  { %259 = vadd.xlane.f32.xlu1 %v258_v49 }
 0x2ea   :  { %v257_v50 = vpop.xlane.xlu1 %256 }
 0x2eb   :  { %v261_v51 = vmul.f32 0.03125, %v257_v50 }
 0x2ed   :  { %v263_v52 = vadd.f32 1e-05, %v261_v51 }
 0x2ee   :  { %v260_v53 = vpop.xlane.xlu1 %259 }
 0x2ef   :  { %384 = vrsqrt.f32 %v263_v52  ;;  %v262_v54 = vmul.f32 0.03125, %v260_v53 }
 0x2f1   :  { %v264_v55 = vadd.f32 1e-05, %v262_v54 }
 0x2f3   :  { %386 = vrsqrt.f32 %v264_v55 }
 0x2f9   :  { %v385_v56 = vpop.eup %384 }
 0x2fa   :  { %v267_v58 = vmul.f32 %v385_v56, %v251_v42 }
 0x2fc   :  { %v275_v60 = vmul.f32 %v309_v57, %v267_v58 }
 0x2fd   :  { %v387_v61 = vpop.eup %386 }
 0x2fe   :  { %v268_v62 = vmul.f32 %v387_v61, %v252_v46  ;;  %v283_v63 = vadd.f32 %v310_v59, %v275_v60 }
 0x300   :  { %v276_v0 = vmul.f32 %v309_v57, %v268_v62  ;;  %285 = vst.msk [vmem:[#allocation3] sm:$0xff] %vm38_vm0, %v283_v63 }
 0x302   :  { %v284_v1 = vadd.f32 %v310_v59, %v276_v0 }
 0x304   :  { %286 = vst.msk [vmem:[#allocation3 + $0x8] sm:$0xff] %vm38_vm0, %v284_v1 }
 0x305   :  { %399 = shalt.err (!%p396_p4)
}
 0x306   :  { %s400_s12 = scalar_lea.hbm %s540_s7, 256 }
 0x307   :  { %p401_p5 = scmp.ne.s32.totalorder %s540_s7, %s400_s12  ;;  %p404_p6 = scmp.lt.u32.totalorder %s400_s12, %s540_s7 }
 0x309   :  { %p406_p7 = pnand %p404_p6, %p401_p5 }
 0x30b   :  { %409 = shalt.err (!%p406_p7)
}
 0x30c   :  { %s413_s1 = smov 128   ;;  %s414_s17 = smov 8  }
 0x30d   :  { %298 = dma.vmem_to_hbm [thread:$0]  %s293_s10, 256, %s540_s7, [#allocation4], %s413_s1, %s413_s1, %s414_s17  }
 0x30e   :  { %410 = dma.done.wait [#allocation4], 256  }
 0x30f   :  { %411 = vsyncadd [#allocation4], 4294967040 }
 0x310   :  { %302 = vsyncpa [#allocation4], 1 }

</bundles_post_ra>
